<compile_context>
chip_gen: v7x
topology: tpu7x:2x2x1
jax: 0.10.0
libtpu: 0.0.40
codegen_flags: <defaults>
</compile_context>

<pallas_src>
import jax
import jax.numpy as jnp
from jax.experimental import pallas as pl
from jax.experimental.pallas import tpu as pltpu

H1, H2 = 512, 256        # hidden widths of the discriminator MLP
TB_MAX = 256             # max batch tile (MXU M dimension)
LANE = 128               # vreg lane width
BF16_SUBLANE = 16        # one bf16 vreg holds [16, 128]


def _round_up(x, m):
    return (x + m - 1) // m * m


def _leaky_relu(x, slope=0.2):
    return jnp.where(x > 0, x, slope * x)


def _vmem_capacity_bytes():
    """Physical VMEM per TensorCore; generation-aware with a safe fallback."""
    try:
        info = pltpu.get_tpu_info()
        for attr in ("vmem_capacity_bytes", "vmem_size_bytes", "vmem_bytes"):
            v = getattr(info, attr, None)
            if v:
                return int(v)
    except Exception:
        pass
    return 64 << 20      # v7x per-core VMEM (most conservative of v5e/v6e/v7x)


def _footprint_bytes(tb, tk, x_bytes):
    """Conservative per-step VMEM footprint (streamed tiles double-buffered)."""
    x_tile = 2 * tb * tk * x_bytes            # x tile, double-buffered
    w1_buf = 2 * tk * H1 * 2                  # bf16 w1 slice (count 2x to be safe)
    w2 = H1 * H2 * 2                          # resident bf16 w2
    small = 8 * (H1 + 2 * H2) * 4             # b1, b2, w3 rows (sublane padded)
    acc = tb * H1 * 4                         # f32 accumulator scratch
    out = 2 * tb * LANE * 4                   # (tb, 1) output tile, lane padded
    return x_tile + w1_buf + w2 + small + acc + out


def discriminator_kernel(x_ref, w1_ref, b1_ref, w2_ref, b2_ref, w3_ref, b3_ref,
                         o_ref, acc_ref):
    # x_ref : [TB, TK] f32/bf16 | w1_ref: [TK, 512] bf16 (resident when nk == 1)
    # b1_ref: [1, 512]  f32     | w2_ref: [512,256] bf16 (resident)
    # b2_ref: [1, 256]  f32     | w3_ref: [1, 256]  f32 (last layer as a row)
    # b3_ref: [1]       f32 scalar in SMEM
    # o_ref : [TB, 1]   f32     | acc_ref: [TB, 512] f32 scratch accumulator
    k = pl.program_id(1)

    # Cast the streamed x tile in-kernel; bf16 MXU matmul with f32 accumulation.
    x = x_ref[...].astype(jnp.bfloat16)
    prod = jnp.dot(x, w1_ref[...], preferred_element_type=jnp.float32)

    @pl.when(k == 0)
    def _():                              # first K step: plain store, no read-add
        acc_ref[...] = prod

    @pl.when(k > 0)
    def _():
        acc_ref[...] += prod

    @pl.when(k == pl.num_programs(1) - 1)
    def _():
        h1 = _leaky_relu(acc_ref[...] + b1_ref[...])                  # f32 on VPU
        h2 = jnp.dot(h1.astype(jnp.bfloat16), w2_ref[...],
                     preferred_element_type=jnp.float32) + b2_ref[...]
        h2 = _leaky_relu(h2)
        # Linear(256, 1): N=1 matmul wastes the MXU -> VPU mul + XLU lane reduce.
        h3 = jnp.sum(h2 * w3_ref[...], axis=-1, keepdims=True) + b3_ref[0]
        o_ref[...] = jax.nn.sigmoid(h3).astype(o_ref.dtype)


@jax.jit
def discriminator_forward(img, params):
    """img: [B, C, H, W] (NCHW, like PyTorch). Returns [B, 1] float32."""
    w1, b1, w2, b2, w3, b3 = params
    B = img.shape[0]
    D = w1.shape[0]

    x = img.reshape(B, -1)                 # keep f32; per-tile bf16 cast in-kernel

    budget = _vmem_capacity_bytes() * 3 // 4   # ~48 MiB on v7x, ~96 MiB on v5e/v6e

    # ---- batch tile: 16-aligned (bf16 packing); split so both TensorCores get
    # work (megacore "parallel" axis) whenever more than one vreg-row of batch.
    b16 = _round_up(B, BF16_SUBLANE)
    if b16 > BF16_SUBLANE:
        tb = min(TB_MAX, _round_up(-(-b16 // 2), BF16_SUBLANE))
    else:
        tb = b16
    b_pad = _round_up(B, tb)

    # ---- K tiling: keep w1 fully resident whenever it fits the budget;
    # otherwise pick the smallest nk (largest lane-aligned tk) that fits.
    if _footprint_bytes(tb, _round_up(D, LANE), 4) <= budget:
        nk = 1
        tk = d_pad = D                     # full-dim block: no K padding at all
    else:
        nk = 2
        while True:
            tk = _round_up(-(-D // nk), LANE)
            if _footprint_bytes(tb, tk, 4) <= budget or tk == LANE:
                break
            nk += 1
        d_pad = nk * tk
        # TODO(synk): when w1 cannot be resident AND nb > 1, reorder the grid to
        # (nk outer, nb inner) with a full-batch accumulator so each w1 K-slice
        # streams from HBM exactly once per forward instead of nb times.

    # ---- padding (both x cols and w1 rows zero-padded -> inert contributions).
    if b_pad != B or d_pad != D:
        # A copy is unavoidable here, so pad in bf16 to halve the copied bytes.
        x = jnp.pad(x.astype(jnp.bfloat16), ((0, b_pad - B), (0, d_pad - D)))
    w1p = jnp.pad(w1, ((0, d_pad - D), (0, 0))) if d_pad != D else w1

    nb = b_pad // tb

    out = pl.pallas_call(
        discriminator_kernel,
        out_shape=jax.ShapeDtypeStruct((b_pad, 1), jnp.float32),
        grid_spec=pltpu.PrefetchScalarGridSpec(
            num_scalar_prefetch=0,
            grid=(nb, nk),
            in_specs=[
                pl.BlockSpec((tb, tk), lambda i, k: (i, k)),        # x tile
                pl.BlockSpec((tk, H1), lambda i, k: (k, 0)),        # w1 (resident when nk==1)
                pl.BlockSpec((1, H1), lambda i, k: (0, 0)),         # b1 (resident)
                pl.BlockSpec((H1, H2), lambda i, k: (0, 0)),        # w2 (resident)
                pl.BlockSpec((1, H2), lambda i, k: (0, 0)),         # b2 (resident)
                pl.BlockSpec((1, H2), lambda i, k: (0, 0)),         # w3 row
                pl.BlockSpec(memory_space=pltpu.MemorySpace.SMEM),  # b3 scalar
            ],
            out_specs=pl.BlockSpec((tb, 1), lambda i, k: (i, 0)),
            scratch_shapes=[pltpu.VMEM((tb, H1), jnp.float32)],
        ),
        compiler_params=pltpu.CompilerParams(
            dimension_semantics=("parallel", "arbitrary"),
            vmem_limit_bytes=int(budget),
        ),
    )(x, w1p, b1, w2, b2, w3, b3)

    return out[:B]


def init_params(key, in_features):
    """PyTorch-style Linear init: U(-1/sqrt(fan_in), 1/sqrt(fan_in)).

    Weights stored transposed ([in, out]); w1/w2 as bf16 (MXU-native),
    w3 as a (1, 256) f32 row for the VPU/XLU reduction; biases f32.
    """
    dims = [(in_features, H1), (H1, H2), (H2, 1)]
    raw = []
    for i, (fan_in, fan_out) in enumerate(dims):
        kw, kb = jax.random.split(jax.random.fold_in(key, i))
        bound = 1.0 / jnp.sqrt(jnp.float32(fan_in))
        w = jax.random.uniform(kw, (fan_in, fan_out), jnp.float32, -bound, bound)
        b = jax.random.uniform(kb, (fan_out,), jnp.float32, -bound, bound)
        raw.append((w, b))
    (w1, b1), (w2, b2), (w3, b3) = raw
    return (w1.astype(jnp.bfloat16), b1.reshape(1, H1),
            w2.astype(jnp.bfloat16), b2.reshape(1, H2),
            w3.reshape(1, H2), b3.reshape(1))


def reference_forward(img, params):
    """Plain-JAX reference with the same bf16-matmul / f32-accumulate recipe."""
    w1, b1, w2, b2, w3, b3 = params
    x = img.reshape(img.shape[0], -1).astype(jnp.bfloat16)
    h = jnp.dot(x, w1, preferred_element_type=jnp.float32) + b1
    h = jnp.where(h > 0, h, 0.2 * h)
    h = jnp.dot(h.astype(jnp.bfloat16), w2, preferred_element_type=jnp.float32) + b2
    h = jnp.where(h > 0, h, 0.2 * h)
    h = jnp.sum(h * w3, axis=-1, keepdims=True) + b3[0]
    return jax.nn.sigmoid(h)


if __name__ == "__main__":
    # Small shapes consistent with the module: img_shape = (C, H, W) = (1, 16, 16)
    B, C, Himg, Wimg = 2, 1, 16, 16
    D = C * Himg * Wimg

    key = jax.random.PRNGKey(0)
    k_img, k_par = jax.random.split(key)
    img = jax.random.normal(k_img, (B, C, Himg, Wimg), jnp.float32)
    params = init_params(k_par, D)

    out = jax.block_until_ready(discriminator_forward(img, params))
    ref = reference_forward(img, params)

    assert out.shape == (B, 1), out.shape
    assert jnp.allclose(out, ref, atol=1e-2, rtol=1e-2), (out, ref)

    print("KERNEL_OK")
</pallas_src>

<mosaic_0001>
module attributes {stable_mosaic.version = 11 : i64} {
  func.func @discriminator_kernel(%arg0: i32, %arg1: i32, %arg2: memref<16x256xbf16, #tpu.memory_space<vmem>>, %arg3: memref<256x512xbf16, #tpu.memory_space<vmem>>, %arg4: memref<1x512xf32, #tpu.memory_space<vmem>>, %arg5: memref<512x256xbf16, #tpu.memory_space<vmem>>, %arg6: memref<1x256xf32, #tpu.memory_space<vmem>>, %arg7: memref<1x256xf32, #tpu.memory_space<vmem>>, %arg8: memref<1xf32, #tpu.memory_space<smem>>, %arg9: memref<16x1xf32, #tpu.memory_space<vmem>>, %arg10: memref<16x512xf32, #tpu.memory_space<vmem>>) attributes {dimension_semantics = [#tpu.dimension_semantics<parallel>, #tpu.dimension_semantics<arbitrary>], iteration_bounds = array<i64: 1, 1>, scalar_prefetch = 0 : i64, scratch_operands = 1 : i64, tpu.core_type = #tpu.core_type<tc>, window_params = [{transform_indices = @transform_0, window_bounds = array<i64: 16, 256>}, {transform_indices = @transform_1, window_bounds = array<i64: 256, 512>}, {pipeline_mode = #tpu.pipeline_mode<synchronous>, transform_indices = @transform_2, window_bounds = array<i64: 1, 512>}, {pipeline_mode = #tpu.pipeline_mode<synchronous>, transform_indices = @transform_3, window_bounds = array<i64: 512, 256>}, {pipeline_mode = #tpu.pipeline_mode<synchronous>, transform_indices = @transform_4, window_bounds = array<i64: 1, 256>}, {pipeline_mode = #tpu.pipeline_mode<synchronous>, transform_indices = @transform_5, window_bounds = array<i64: 1, 256>}, {transform_indices = @transform_6, window_bounds = array<i64: 1>}, {transform_indices = @transform_7, window_bounds = array<i64: 16, 1>}]} {
    %c0 = arith.constant 0 : index
    %c0_0 = arith.constant 0 : index
    %0 = vector.load %arg2[%c0, %c0_0] : memref<16x256xbf16, #tpu.memory_space<vmem>>, vector<16x256xbf16>
    %c0_1 = arith.constant 0 : index
    %c0_2 = arith.constant 0 : index
    %1 = vector.load %arg3[%c0_1, %c0_2] : memref<256x512xbf16, #tpu.memory_space<vmem>>, vector<256x512xbf16>
    %cst = arith.constant dense<0.000000e+00> : vector<16x512xf32>
    %2 = tpu.matmul %0, %1, %cst {dimension_numbers = #tpu.dot_dimension_numbers<[1], [0], [0], [1], [0, 0, 1, 1], [], []>} : vector<16x256xbf16>, vector<256x512xbf16>, vector<16x512xf32> -> vector<16x512xf32>
    %c0_i32 = arith.constant 0 : i32
    %3 = arith.cmpi eq, %arg1, %c0_i32 : i32
    %4 = arith.extui %3 : i1 to i32
    %c0_i32_3 = arith.constant 0 : i32
    %5 = arith.cmpi ne, %4, %c0_i32_3 : i32
    scf.if %5 {
      %c0_8 = arith.constant 0 : index
      %c0_9 = arith.constant 0 : index
      %12 = vector.load %arg10[%c0_8, %c0_9] : memref<16x512xf32, #tpu.memory_space<vmem>>, vector<16x512xf32>
      tpu.vector_store %arg10[%c0_8, %c0_9], %2 {strides = array<i32>} : memref<16x512xf32, #tpu.memory_space<vmem>>, vector<16x512xf32>,
    } else {
    }
    %c0_i32_4 = arith.constant 0 : i32
    %6 = arith.cmpi sgt, %arg1, %c0_i32_4 : i32
    %7 = arith.extui %6 : i1 to i32
    %c0_i32_5 = arith.constant 0 : i32
    %8 = arith.cmpi ne, %7, %c0_i32_5 : i32
    scf.if %8 {
      %c0_8 = arith.constant 0 : index
      %c0_9 = arith.constant 0 : index
      %12 = vector.load %arg10[%c0_8, %c0_9] : memref<16x512xf32, #tpu.memory_space<vmem>>, vector<16x512xf32>
      %13 = arith.addf %12, %2 : vector<16x512xf32>
      %c0_10 = arith.constant 0 : index
      %c0_11 = arith.constant 0 : index
      %14 = vector.load %arg10[%c0_10, %c0_11] : memref<16x512xf32, #tpu.memory_space<vmem>>, vector<16x512xf32>
      tpu.vector_store %arg10[%c0_10, %c0_11], %13 {strides = array<i32>} : memref<16x512xf32, #tpu.memory_space<vmem>>, vector<16x512xf32>,
    } else {
    }
    %c0_i32_6 = arith.constant 0 : i32
    %9 = arith.cmpi eq, %arg1, %c0_i32_6 : i32
    %10 = arith.extui %9 : i1 to i32
    %c0_i32_7 = arith.constant 0 : i32
    %11 = arith.cmpi ne, %10, %c0_i32_7 : i32
    scf.if %11 {
      %c0_8 = arith.constant 0 : index
      %c0_9 = arith.constant 0 : index
      %12 = vector.load %arg10[%c0_8, %c0_9] : memref<16x512xf32, #tpu.memory_space<vmem>>, vector<16x512xf32>
      %c0_10 = arith.constant 0 : index
      %c0_11 = arith.constant 0 : index
      %13 = vector.load %arg4[%c0_10, %c0_11] : memref<1x512xf32, #tpu.memory_space<vmem>>, vector<1x512xf32>
      %14 = vector.broadcast %13 : vector<1x512xf32> to vector<16x512xf32>
      %15 = arith.addf %12, %14 : vector<16x512xf32>
      %cst_12 = arith.constant 0.000000e+00 : f32
      %16 = vector.broadcast %cst_12 : f32 to vector<16x512xf32>
      %17 = arith.cmpf ogt, %15, %16 : vector<16x512xf32>
      %cst_13 = arith.constant 2.000000e-01 : f32
      %18 = vector.broadcast %cst_13 : f32 to vector<16x512xf32>
      %19 = arith.mulf %18, %15 : vector<16x512xf32>
      %20 = arith.select %17, %15, %19 : vector<16x512xi1>, vector<16x512xf32>
      %21 = arith.truncf %20 : vector<16x512xf32> to vector<16x512xbf16>
      %c0_14 = arith.constant 0 : index
      %c0_15 = arith.constant 0 : index
      %22 = vector.load %arg5[%c0_14, %c0_15] : memref<512x256xbf16, #tpu.memory_space<vmem>>, vector<512x256xbf16>
      %cst_16 = arith.constant dense<0.000000e+00> : vector<16x256xf32>
      %23 = tpu.matmul %21, %22, %cst_16 {dimension_numbers = #tpu.dot_dimension_numbers<[1], [0], [0], [1], [0, 0, 1, 1], [], []>} : vector<16x512xbf16>, vector<512x256xbf16>, vector<16x256xf32> -> vector<16x256xf32>
      %c0_17 = arith.constant 0 : index
      %c0_18 = arith.constant 0 : index
      %24 = vector.load %arg6[%c0_17, %c0_18] : memref<1x256xf32, #tpu.memory_space<vmem>>, vector<1x256xf32>
      %25 = vector.broadcast %24 : vector<1x256xf32> to vector<16x256xf32>
      %26 = arith.addf %23, %25 : vector<16x256xf32>
      %cst_19 = arith.constant 0.000000e+00 : f32
      %27 = vector.broadcast %cst_19 : f32 to vector<16x256xf32>
      %28 = arith.cmpf ogt, %26, %27 : vector<16x256xf32>
      %cst_20 = arith.constant 2.000000e-01 : f32
      %29 = vector.broadcast %cst_20 : f32 to vector<16x256xf32>
      %30 = arith.mulf %29, %26 : vector<16x256xf32>
      %31 = arith.select %28, %26, %30 : vector<16x256xi1>, vector<16x256xf32>
      %c0_21 = arith.constant 0 : index
      %c0_22 = arith.constant 0 : index
      %32 = vector.load %arg7[%c0_21, %c0_22] : memref<1x256xf32, #tpu.memory_space<vmem>>, vector<1x256xf32>
      %33 = vector.broadcast %32 : vector<1x256xf32> to vector<16x256xf32>
      %34 = arith.mulf %31, %33 : vector<16x256xf32>
      %cst_23 = arith.constant dense<0.000000e+00> : vector<16xf32>
      %35 = vector.multi_reduction <add>, %34, %cst_23 [1] : vector<16x256xf32> to vector<16xf32>
      %36 = vector.shape_cast %35 : vector<16xf32> to vector<16x1xf32>
      %c0_24 = arith.constant 0 : index
      %37 = memref.load %arg8[%c0_24] : memref<1xf32, #tpu.memory_space<smem>>
      %38 = vector.broadcast %37 : f32 to vector<16x1xf32>
      %39 = arith.addf %36, %38 : vector<16x1xf32>
      %40 = arith.negf %39 : vector<16x1xf32>
      %41 = math.exp %40 : vector<16x1xf32>
      %cst_25 = arith.constant 1.000000e+00 : f32
      %42 = vector.broadcast %cst_25 : f32 to vector<16x1xf32>
      %43 = arith.addf %42, %41 : vector<16x1xf32>
      %44 = arith.divf %42, %43 : vector<16x1xf32>
      %c0_26 = arith.constant 0 : index
      %c0_27 = arith.constant 0 : index
      %45 = vector.load %arg9[%c0_26, %c0_27] : memref<16x1xf32, #tpu.memory_space<vmem>>, vector<16x1xf32>
      tpu.vector_store %arg9[%c0_26, %c0_27], %44 {strides = array<i32>} : memref<16x1xf32, #tpu.memory_space<vmem>>, vector<16x1xf32>,
    } else {
    }
    return
  }
  func.func @transform_0(%arg0: i32, %arg1: i32) -> (i32, i32) {
    %c0_i32 = arith.constant 0 : i32
    return %arg0, %arg1 : i32, i32
  }
  func.func @transform_1(%arg0: i32, %arg1: i32) -> (i32, i32) {
    %c0_i32 = arith.constant 0 : i32
    %c0_i32_0 = arith.constant 0 : i32
    return %arg1, %c0_i32 : i32, i32
  }
  func.func @transform_2(%arg0: i32, %arg1: i32) -> (i32, i32) {
    %c0_i32 = arith.constant 0 : i32
    %c0_i32_0 = arith.constant 0 : i32
    %c0_i32_1 = arith.constant 0 : i32
    return %c0_i32, %c0_i32_0 : i32, i32
  }
  func.func @transform_3(%arg0: i32, %arg1: i32) -> (i32, i32) {
    %c0_i32 = arith.constant 0 : i32
    %c0_i32_0 = arith.constant 0 : i32
    %c0_i32_1 = arith.constant 0 : i32
    return %c0_i32, %c0_i32_0 : i32, i32
  }
  func.func @transform_4(%arg0: i32, %arg1: i32) -> (i32, i32) {
    %c0_i32 = arith.constant 0 : i32
    %c0_i32_0 = arith.constant 0 : i32
    %c0_i32_1 = arith.constant 0 : i32
    return %c0_i32, %c0_i32_0 : i32, i32
  }
  func.func @transform_5(%arg0: i32, %arg1: i32) -> (i32, i32) {
    %c0_i32 = arith.constant 0 : i32
    %c0_i32_0 = arith.constant 0 : i32
    %c0_i32_1 = arith.constant 0 : i32
    return %c0_i32, %c0_i32_0 : i32, i32
  }
  func.func @transform_6(%arg0: i32, %arg1: i32) -> i32 {
    %c0_i32 = arith.constant 0 : i32
    %c0_i32_0 = arith.constant 0 : i32
    return %c0_i32 : i32
  }
  func.func @transform_7(%arg0: i32, %arg1: i32) -> (i32, i32) {
    %c0_i32 = arith.constant 0 : i32
    %c0_i32_0 = arith.constant 0 : i32
    return %arg0, %c0_i32 : i32, i32
  }
}

</mosaic_0001>

<bundles_post_ra>
// kernel: discriminator_forward.1
= control target key start
LH: loop header
LB: loop body
LE: loop exit
PB: predicated region body
PF: predicated region fallthrough
CT: control target
= control target key end

     0   :  { %13 = vsyncpa [#allocation5], 0  ;;  %s1708_s0 = inlined_call_operand.vmem [shape: bf16[16,256], index: 0, kind: input, shape index: {}]   ;;  %s1709_s1 = inlined_call_operand.hbm [shape: bf16[256,512], index: 1, kind: input, shape index: {}]   ;;  %s1710_s2 = inlined_call_operand.vmem [shape: f32[1,512], index: 2, kind: input, shape index: {}]   ;;  %s1711_s3 = inlined_call_operand.hbm [shape: bf16[512,256], index: 3, kind: input, shape index: {}]   ;;  %s1712_s4 = inlined_call_operand.vmem [shape: f32[1,256], index: 4, kind: input, shape index: {}]   ;;  %s1713_s5 = inlined_call_operand.vmem [shape: f32[1,256], index: 5, kind: input, shape index: {}]   ;;  %s1714_s6 = inlined_call_operand.<no memory space> [shape: f32[1], index: 6, kind: input, shape index: {}]   ;;  %s1715_s7 = inlined_call_operand.vmem [shape: f32[16,1], index: 7, kind: output, shape index: {}]  }
   0x1   :  { %14 = vsyncpa [#allocation7], 0  ;;  %s1584_s24 = smov [#allocation4]   ;;  %s1536_s28 = scalar_lea.hbm %s1709_s1, 8192 }
   0x2   :  { %s22_s25 = sshll.u32 %s1584_s24, 4  ;;  %p1537_p0 = scmp.ne.s32.totalorder %s1709_s1, %s1536_s28  ;;  %s23_s25 = int_to_ptr.vmem [resolvable:$true] %s22_s25 }
   0x3   :  { %p1540_p1 = scmp.lt.u32.totalorder %s1536_s28, %s1709_s1 }
   0x5   :  { %p1542_p2 = pnand %p1540_p1, %p1537_p0 }
   0x7   :  { %1545 = shalt.err (!%p1542_p2)
}
   0x8   :  { %s1546_s10 = scalar_lea.vmem %s23_s25, 8192  ;;  %p1551_p4 = scmp.lt.s32.totalorder %s23_s25, %s23_s25 }
   0x9   :  { %p1547_p3 = scmp.ne.s32.totalorder %s23_s25, %s1546_s10  ;;  %p1552_p5 = scmp.lt.s32.totalorder %s1546_s10, %s1546_s10 }
   0xb   :  { %p1553_p6 = por %p1552_p5, %p1551_p4 }
   0xd   :  { %p1554_p7 = pnand %p1553_p6, %p1547_p3 }
   0xf   :  { %1557 = shalt.err (!%p1554_p7)
}
  0x10   :  { %s1585_s11 = smov 256   ;;  %s1586_s12 = smov 16  }
  0x11   :  { %28 = dma.hbm_to_vmem [thread:$0]  %s1709_s1, 8192, %s23_s25, [#allocation5], %s1585_s11, %s1585_s11, %s1586_s12  }
  0x12   :  { %s1587_s15 = smov [#allocation6]   ;;  %s1558_s19 = scalar_lea.hbm %s1711_s3, 8192 }
  0x13   :  { %s36_s16 = sshll.u32 %s1587_s15, 4  ;;  %p1559_p8 = scmp.ne.s32.totalorder %s1711_s3, %s1558_s19  ;;  %s37_s16 = int_to_ptr.vmem [resolvable:$true] %s36_s16 }
  0x14   :  { %p1562_p9 = scmp.lt.u32.totalorder %s1558_s19, %s1711_s3 }
  0x16   :  { %p1564_p10 = pnand %p1562_p9, %p1559_p8 }
  0x18   :  { %1567 = shalt.err (!%p1564_p10)
}
  0x19   :  { %s1568_s24 = scalar_lea.vmem %s37_s16, 8192  ;;  %p1573_p12 = scmp.lt.s32.totalorder %s37_s16, %s37_s16 }
  0x1a   :  { %p1569_p11 = scmp.ne.s32.totalorder %s37_s16, %s1568_s24  ;;  %p1574_p13 = scmp.lt.s32.totalorder %s1568_s24, %s1568_s24 }
  0x1c   :  { %p1575_p0 = por %p1574_p13, %p1573_p12 }
  0x1e   :  { %p1576_p1 = pnand %p1575_p0, %p1569_p11 }
  0x20   :  { %1579 = shalt.err (!%p1576_p1)
}
  0x21   :  { %s1588_s1 = smov 128   ;;  %s1589_s25 = smov 8  }
  0x22   :  { %42 = dma.hbm_to_vmem [thread:$0]  %s1711_s3, 8192, %s37_s16, [#allocation7], %s1588_s1, %s1588_s1, %s1589_s25  }
  0x23   :  { %1580 = dma.done.wait [#allocation5], 8192  }
  0x24   :  { %1581 = vsyncadd [#allocation5], 4294959104 }
  0x25   :  { %1582 = dma.done.wait [#allocation7], 8192  }
  0x26   :  { %1583 = vsyncadd [#allocation7], 4294959104  ;;  %v1333_v0 = vld [vmem:[#allocation4 + $0x4] ss:$16 sps:$4 sm:$0xff]   ;;  %v1335_v1 = vld [vmem:[#allocation4] ss:$16 sps:$4 sm:$0xff]  }
  0x27   :  { %451 = vmatprep.subr.bf16.mxu1 %v1333_v0  ;;  %v1336_v2 = vld [vmem:[#allocation4 + $0x24] ss:$16 sps:$4 sm:$0xff]   ;;  %v1338_v3 = vld [vmem:[#allocation4 + $0x20] ss:$16 sps:$4 sm:$0xff]   ;;  %v1386_v42 = vld [vmem:[#allocation4 + $0xc] ss:$16 sps:$4 sm:$0xff]  }
  0x28   :  { %452 = vmatpush1.bf16.msra.mxu1 %v1335_v1  ;;  %v1339_v4 = vld [vmem:[#allocation4 + $0x44] ss:$16 sps:$4 sm:$0xff]   ;;  %v1341_v5 = vld [vmem:[#allocation4 + $0x40] ss:$16 sps:$4 sm:$0xff]   ;;  %v1384_v46 = vld [vmem:[#allocation4 + $0x8] ss:$16 sps:$4 sm:$0xff]  }
  0x29   :  { %453 = vmatprep.subr.bf16.mxu1 %v1336_v2  ;;  %v1342_v6 = vld [vmem:[#allocation4 + $0x64] ss:$16 sps:$4 sm:$0xff]   ;;  %v1344_v7 = vld [vmem:[#allocation4 + $0x60] ss:$16 sps:$4 sm:$0xff]   ;;  %v1389_v47 = vld [vmem:[#allocation4 + $0x2c] ss:$16 sps:$4 sm:$0xff]  }
  0x2a   :  { %v1345_v8 = vld [vmem:[#allocation4 + $0x84] ss:$16 sps:$4 sm:$0xff]   ;;  %v1347_v9 = vld [vmem:[#allocation4 + $0x80] ss:$16 sps:$4 sm:$0xff]   ;;  %v1387_v50 = vld [vmem:[#allocation4 + $0x28] ss:$16 sps:$4 sm:$0xff]  }
  0x2b   :  { %v1348_v10 = vld [vmem:[#allocation4 + $0xa4] ss:$16 sps:$4 sm:$0xff]   ;;  %v1350_v11 = vld [vmem:[#allocation4 + $0xa0] ss:$16 sps:$4 sm:$0xff]   ;;  %v1392_v51 = vld [vmem:[#allocation4 + $0x4c] ss:$16 sps:$4 sm:$0xff]  }
  0x2c   :  { %454 = vmatpush1.bf16.msra.mxu1 %v1338_v3  ;;  %v1351_v12 = vld [vmem:[#allocation4 + $0xc4] ss:$16 sps:$4 sm:$0xff]   ;;  %v1353_v14 = vld [vmem:[#allocation4 + $0xc0] ss:$16 sps:$4 sm:$0xff]   ;;  %v1390_v54 = vld [vmem:[#allocation4 + $0x48] ss:$16 sps:$4 sm:$0xff]  }
  0x2d   :  { %455 = vmatprep.subr.bf16.mxu1 %v1339_v4  ;;  %v1657_v13 = vld [vmem:[%s1708_s0 + $0x4] ss:$8 sps:$4 sm:$0xff]   ;;  %v1356_v16 = vld [vmem:[#allocation4 + $0xe0] ss:$16 sps:$4 sm:$0xff]   ;;  %v1435_v29 = vld [vmem:[#allocation6 + $0x14] ss:$8 sps:$4 sm:$0xff]  }
  0x2e   :  { %v1354_v15 = vld [vmem:[#allocation4 + $0xe4] ss:$16 sps:$4 sm:$0xff]   ;;  %483 = vmatprep.mubr.bf16.mxu1 %v1657_v13  ;;  %v1359_v18 = vld [vmem:[#allocation4 + $0x100] ss:$16 sps:$4 sm:$0xff]   ;;  %v1395_v55 = vld [vmem:[#allocation4 + $0x6c] ss:$16 sps:$4 sm:$0xff]  }
  0x2f   :  { %v1357_v17 = vld [vmem:[#allocation4 + $0x104] ss:$16 sps:$4 sm:$0xff]   ;;  %v1362_v20 = vld [vmem:[#allocation4 + $0x120] ss:$16 sps:$4 sm:$0xff]   ;;  %v1393_v58 = vld [vmem:[#allocation4 + $0x68] ss:$16 sps:$4 sm:$0xff]  }
  0x30   :  { %456 = vmatpush1.bf16.msra.mxu1 %v1341_v5  ;;  %v1360_v19 = vld [vmem:[#allocation4 + $0x124] ss:$16 sps:$4 sm:$0xff]   ;;  %v1365_v22 = vld [vmem:[#allocation4 + $0x140] ss:$16 sps:$4 sm:$0xff]   ;;  %v1398_v59 = vld [vmem:[#allocation4 + $0x8c] ss:$16 sps:$4 sm:$0xff]  }
  0x31   :  { %457 = vmatprep.subr.bf16.mxu1 %v1342_v6  ;;  %v1363_v21 = vld [vmem:[#allocation4 + $0x144] ss:$16 sps:$4 sm:$0xff]   ;;  %v1368_v24 = vld [vmem:[#allocation4 + $0x160] ss:$16 sps:$4 sm:$0xff]   ;;  %v1396_v62 = vld [vmem:[#allocation4 + $0x88] ss:$16 sps:$4 sm:$0xff]  }
  0x32   :  { %v1366_v23 = vld [vmem:[#allocation4 + $0x164] ss:$16 sps:$4 sm:$0xff]   ;;  %v1434_v27 = vld [vmem:[#allocation6] ss:$8 sps:$4 sm:$0xff]   ;;  %v1437_v31 = vld [vmem:[#allocation6 + $0x10] ss:$8 sps:$4 sm:$0xff]  }
  0x33   :  { %v1369_v25 = vld [vmem:[#allocation4 + $0x184] ss:$16 sps:$4 sm:$0xff]   ;;  %v1371_v28 = vld [vmem:[#allocation4 + $0x180] ss:$16 sps:$4 sm:$0xff]   ;;  %v1401_v63 = vld [vmem:[#allocation4 + $0xac] ss:$16 sps:$4 sm:$0xff]  }
  0x34   :  { %458 = vmatpush1.bf16.msra.mxu1 %v1344_v7  ;;  %v1432_v26 = vld [vmem:[#allocation6 + $0x4] ss:$8 sps:$4 sm:$0xff]   ;;  %v1374_v33 = vld [vmem:[#allocation4 + $0x1a0] ss:$16 sps:$4 sm:$0xff]   ;;  %v1441_v36 = vld [vmem:[#allocation6 + $0x34] ss:$8 sps:$4 sm:$0xff]  }
  0x35   :  { %459 = vmatprep.subr.bf16.mxu1 %v1345_v8  ;;  %1042 = vmatprep.subr.bf16.mxu0 %v1432_v26  ;;  %v1372_v30 = vld [vmem:[#allocation4 + $0x1a4] ss:$16 sps:$4 sm:$0xff]   ;;  %v1440_v35 = vld [vmem:[#allocation6 + $0x20] ss:$8 sps:$4 sm:$0xff]   ;;  %v1443_v39 = vld [vmem:[#allocation6 + $0x30] ss:$8 sps:$4 sm:$0xff]  }
  0x36   :  { %1043 = vmatpush1.bf16.msra.mxu0 %v1434_v27  ;;  %v1438_v32 = vld [vmem:[#allocation6 + $0x24] ss:$8 sps:$4 sm:$0xff]   ;;  %v1377_v37 = vld [vmem:[#allocation4 + $0x1c0] ss:$16 sps:$4 sm:$0xff]   ;;  %v1447_v45 = vld [vmem:[#allocation6 + $0x54] ss:$8 sps:$4 sm:$0xff]  }
  0x37   :  { %1044 = vmatprep.subr.bf16.mxu0 %v1435_v29  ;;  %v1375_v34 = vld [vmem:[#allocation4 + $0x1c4] ss:$16 sps:$4 sm:$0xff]   ;;  %v1380_v41 = vld [vmem:[#allocation4 + $0x1e0] ss:$16 sps:$4 sm:$0xff]   ;;  %v1399_v2 = vld [vmem:[#allocation4 + $0xa8] ss:$16 sps:$4 sm:$0xff]  }
  0x38   :  { %460 = vmatpush1.bf16.msra.mxu1 %v1347_v9  ;;  %v1378_v38 = vld [vmem:[#allocation4 + $0x1e4] ss:$16 sps:$4 sm:$0xff]   ;;  %v1446_v43 = vld [vmem:[#allocation6 + $0x40] ss:$8 sps:$4 sm:$0xff]   ;;  %v1449_v48 = vld [vmem:[#allocation6 + $0x50] ss:$8 sps:$4 sm:$0xff]  }
  0x39   :  { %461 = vmatprep.subr.bf16.mxu1 %v1348_v10  ;;  %v1444_v40 = vld [vmem:[#allocation6 + $0x44] ss:$8 sps:$4 sm:$0xff]   ;;  %v1663_v44 = vld [vmem:[%s1708_s0] ss:$8 sps:$4 sm:$0xff]   ;;  %v1453_v53 = vld [vmem:[#allocation6 + $0x74] ss:$8 sps:$4 sm:$0xff]  }
  0x3a   :  { %1045 = vmatpush1.bf16.msra.mxu0 %v1437_v31  ;;  %v1450_v49 = vld [vmem:[#allocation6 + $0x64] ss:$8 sps:$4 sm:$0xff]   ;;  %v1452_v52 = vld [vmem:[#allocation6 + $0x60] ss:$8 sps:$4 sm:$0xff]   ;;  %v1455_v56 = vld [vmem:[#allocation6 + $0x70] ss:$8 sps:$4 sm:$0xff]  }
  0x3b   :  { %1046 = vmatprep.subr.bf16.mxu0 %v1438_v32  ;;  %v1456_v57 = vld [vmem:[#allocation6 + $0x84] ss:$8 sps:$4 sm:$0xff]   ;;  %v1458_v60 = vld [vmem:[#allocation6 + $0x80] ss:$8 sps:$4 sm:$0xff]   ;;  %v1459_v61 = vld [vmem:[#allocation6 + $0x94] ss:$8 sps:$4 sm:$0xff]  }
  0x3c   :  { %462 = vmatpush1.bf16.msra.mxu1 %v1350_v11  ;;  %v1461_v0 = vld [vmem:[#allocation6 + $0x90] ss:$8 sps:$4 sm:$0xff]   ;;  %v1462_v1 = vld [vmem:[#allocation6 + $0xa4] ss:$8 sps:$4 sm:$0xff]   ;;  %v1464_v4 = vld [vmem:[#allocation6 + $0xa0] ss:$8 sps:$4 sm:$0xff]  }
  0x3d   :  { %463 = vmatprep.subr.bf16.mxu1 %v1351_v12  ;;  %v1404_v3 = vld [vmem:[#allocation4 + $0xcc] ss:$16 sps:$4 sm:$0xff]   ;;  %v1402_v6 = vld [vmem:[#allocation4 + $0xc8] ss:$16 sps:$4 sm:$0xff]   ;;  %vm1178_vm12 = vcmask 7168  }
  0x3e   :  { %1047 = vmatpush1.bf16.msra.mxu0 %v1440_v35  ;;  %v1465_v5 = vld [vmem:[#allocation6 + $0xb4] ss:$8 sps:$4 sm:$0xff]   ;;  %v1467_v8 = vld [vmem:[#allocation6 + $0xb0] ss:$8 sps:$4 sm:$0xff]   ;;  %v1468_v9 = vld [vmem:[#allocation6 + $0xc4] ss:$8 sps:$4 sm:$0xff]   ;;  %v590_v35 = vlaneseq }
  0x3f   :  { %1048 = vmatprep.subr.bf16.mxu0 %v1441_v36  ;;  %v1407_v7 = vld [vmem:[#allocation4 + $0xec] ss:$16 sps:$4 sm:$0xff]   ;;  %v1405_v10 = vld [vmem:[#allocation4 + $0xe8] ss:$16 sps:$4 sm:$0xff]  }
  0x40   :  { %464 = vmatpush1.bf16.msra.mxu1 %v1353_v14  ;;  %v1410_v11 = vld [vmem:[#allocation4 + $0x10c] ss:$16 sps:$4 sm:$0xff]   ;;  %v1470_v12 = vld [vmem:[#allocation6 + $0xc0] ss:$8 sps:$4 sm:$0xff]   ;;  %v1473_v29 = vld [vmem:[#allocation6 + $0xd0] ss:$8 sps:$4 sm:$0xff]  }
  0x41   :  { %465 = vmatprep.subr.bf16.mxu1 %v1354_v15  ;;  %v1413_v14 = vld [vmem:[#allocation4 + $0x12c] ss:$16 sps:$4 sm:$0xff]   ;;  %v1411_v15 = vld [vmem:[#allocation4 + $0x128] ss:$16 sps:$4 sm:$0xff]   ;;  %v1668_v36 = vshrl.u32 %v590_v35, 7 }
  0x42   :  { %1049 = vmatpush1.bf16.msra.mxu0 %v1443_v39  ;;  %v1431_v26 = vld [vmem:[#allocation4 + $0x1ec] ss:$16 sps:$4 sm:$0xff]   ;;  %v1429_v27 = vld [vmem:[#allocation4 + $0x1e8] ss:$16 sps:$4 sm:$0xff]  }
  0x43   :  { %1050 = vmatprep.subr.bf16.mxu0 %v1444_v40  ;;  %v1476_v31 = vld [vmem:[#allocation6 + $0xe0] ss:$8 sps:$4 sm:$0xff]   ;;  %v1477_v32 = vld [vmem:[#allocation6 + $0xf4] ss:$8 sps:$4 sm:$0xff]   ;;  %v1679_v39 = vsub.s32 1, %v1668_v36 }
  0x44   :  { %466 = vmatpush1.bf16.msra.mxu1 %v1356_v16  ;;  %v1416_v16 = vld [vmem:[#allocation4 + $0x14c] ss:$16 sps:$4 sm:$0xff]  }
  0x45   :  { %467 = vmatprep.subr.bf16.mxu1 %v1357_v17  ;;  %v1414_v17 = vld [vmem:[#allocation4 + $0x148] ss:$16 sps:$4 sm:$0xff]  }
  0x46   :  { %1051 = vmatpush1.bf16.msra.mxu0 %v1446_v43 }
  0x47   :  { %1052 = vmatprep.subr.bf16.mxu0 %v1447_v45 }
  0x48   :  { %468 = vmatpush1.bf16.msra.mxu1 %v1359_v18  ;;  %v1419_v18 = vld [vmem:[#allocation4 + $0x16c] ss:$16 sps:$4 sm:$0xff]  }
  0x49   :  { %469 = vmatprep.subr.bf16.mxu1 %v1360_v19  ;;  %v1417_v19 = vld [vmem:[#allocation4 + $0x168] ss:$16 sps:$4 sm:$0xff]  }
  0x4a   :  { %1053 = vmatpush1.bf16.msra.mxu0 %v1449_v48 }
  0x4b   :  { %1054 = vmatprep.subr.bf16.mxu0 %v1450_v49 }
  0x4c   :  { %470 = vmatpush1.bf16.msra.mxu1 %v1362_v20  ;;  %v1422_v20 = vld [vmem:[#allocation4 + $0x18c] ss:$16 sps:$4 sm:$0xff]  }
  0x4d   :  { %471 = vmatprep.subr.bf16.mxu1 %v1363_v21  ;;  %v1420_v21 = vld [vmem:[#allocation4 + $0x188] ss:$16 sps:$4 sm:$0xff]  }
  0x4e   :  { %1055 = vmatpush1.bf16.msra.mxu0 %v1452_v52 }
  0x4f   :  { %1056 = vmatprep.subr.bf16.mxu0 %v1453_v53 }
  0x50   :  { %472 = vmatpush1.bf16.msra.mxu1 %v1365_v22  ;;  %v1425_v22 = vld [vmem:[#allocation4 + $0x1ac] ss:$16 sps:$4 sm:$0xff]  }
  0x51   :  { %473 = vmatprep.subr.bf16.mxu1 %v1366_v23  ;;  %v1423_v23 = vld [vmem:[#allocation4 + $0x1a8] ss:$16 sps:$4 sm:$0xff]  }
  0x52   :  { %1057 = vmatpush1.bf16.msra.mxu0 %v1455_v56 }
  0x53   :  { %1058 = vmatprep.subr.bf16.mxu0 %v1456_v57 }
  0x54   :  { %474 = vmatpush1.bf16.msra.mxu1 %v1368_v24  ;;  %v1428_v24 = vld [vmem:[#allocation4 + $0x1cc] ss:$16 sps:$4 sm:$0xff]  }
  0x55   :  { %475 = vmatprep.subr.bf16.mxu1 %v1369_v25  ;;  %v1426_v25 = vld [vmem:[#allocation4 + $0x1c8] ss:$16 sps:$4 sm:$0xff]  }
  0x56   :  { %1059 = vmatpush1.bf16.msra.mxu0 %v1458_v60  ;;  %v1480_v60 = vld [vmem:[#allocation6 + $0x100] ss:$8 sps:$4 sm:$0xff]  }
  0x57   :  { %1060 = vmatprep.subr.bf16.mxu0 %v1459_v61  ;;  %v1485_v61 = vld [vmem:[#allocation6 + $0x114] ss:$8 sps:$4 sm:$0xff]  }
  0x58   :  { %476 = vmatpush1.bf16.msra.mxu1 %v1371_v28  ;;  %v1471_v28 = vld [vmem:[#allocation6 + $0xd4] ss:$8 sps:$4 sm:$0xff]  }
  0x59   :  { %477 = vmatprep.subr.bf16.mxu1 %v1372_v30  ;;  %v1474_v30 = vld [vmem:[#allocation6 + $0xe4] ss:$8 sps:$4 sm:$0xff]  }
  0x5a   :  { %1061 = vmatpush1.bf16.msra.mxu0 %v1461_v0  ;;  %v1486_v0 = vld [vmem:[#allocation6 + $0x120] ss:$8 sps:$4 sm:$0xff]  }
  0x5b   :  { %1062 = vmatprep.subr.bf16.mxu0 %v1462_v1  ;;  %v1491_v1 = vld [vmem:[#allocation6 + $0x134] ss:$8 sps:$4 sm:$0xff]  }
  0x5c   :  { %478 = vmatpush1.bf16.msra.mxu1 %v1374_v33  ;;  %v1479_v33 = vld [vmem:[#allocation6 + $0xf0] ss:$8 sps:$4 sm:$0xff]  }
  0x5d   :  { %479 = vmatprep.subr.bf16.mxu1 %v1375_v34  ;;  %v1482_v34 = vld [vmem:[#allocation6 + $0x104] ss:$8 sps:$4 sm:$0xff]  }
  0x5e   :  { %1063 = vmatpush1.bf16.msra.mxu0 %v1464_v4  ;;  %v1492_v4 = vld [vmem:[#allocation6 + $0x140] ss:$8 sps:$4 sm:$0xff]  }
  0x5f   :  { %1064 = vmatprep.subr.bf16.mxu0 %v1465_v5  ;;  %v1497_v5 = vld [vmem:[#allocation6 + $0x154] ss:$8 sps:$4 sm:$0xff]  }
  0x60   :  { %480 = vmatpush1.bf16.msra.mxu1 %v1377_v37  ;;  %v1671_v37 = vsub.s32 0, %v1668_v36 }
  0x61   :  { %481 = vmatprep.subr.bf16.mxu1 %v1378_v38  ;;  %v1676_v38 = vld [vmem:[%s1710_s2] sm:$0xf] }
  0x62   :  { %1065 = vmatpush1.bf16.msra.mxu0 %v1467_v8  ;;  %v593_v40 = vrot.slane %v1676_v38, %v1671_v37  ;;  %v1498_v8 = vld [vmem:[#allocation6 + $0x160] ss:$8 sps:$4 sm:$0xff]  }
  0x63   :  { %1066 = vmatprep.subr.bf16.mxu0 %v1468_v9  ;;  %v1503_v9 = vld [vmem:[#allocation6 + $0x174] ss:$8 sps:$4 sm:$0xff]  }
  0x64   :  { %482 = vmatpush1.bf16.msra.mxu1 %v1380_v41  ;;  %v597_v41 = vrot.slane %v1676_v38, %v1679_v39 }
  0x65   :  { %494 = vmatprep.subr.bf16.mxu1 %v1386_v42 }
  0x66   :  { %1067 = vmatpush1.bf16.msra.mxu0 %v1470_v12  ;;  %v1504_v12 = vld [vmem:[#allocation6 + $0x180] ss:$8 sps:$4 sm:$0xff]  }
  0x67   :  { %484 = vmatmul.mubr.bf16.vlgmr.msra.gmra.mrb[0].mxu1 %v1663_v44  ;;  %1068 = vmatprep.subr.bf16.mxu0 %v1471_v28 }
  0x68   :  { %495 = vmatpush1.bf16.msra.mxu1 %v1384_v46  ;;  %526 = vmatprep.mubr.bf16.mxu1 %v1657_v13  ;;  %v1408_v13 = vld [vmem:[#allocation4 + $0x108] ss:$16 sps:$4 sm:$0xff]  }
  0x69   :  { %496 = vmatprep.subr.bf16.mxu1 %v1389_v47 }
  0x6a   :  { %1069 = vmatpush1.bf16.msra.mxu0 %v1473_v29 }
  0x6b   :  { %1070 = vmatprep.subr.bf16.mxu0 %v1474_v30 }
  0x6c   :  { %497 = vmatpush1.bf16.msra.mxu1 %v1387_v50 }
  0x6d   :  { %498 = vmatprep.subr.bf16.mxu1 %v1392_v51 }
  0x6e   :  { %1071 = vmatpush1.bf16.msra.mxu0 %v1476_v31  ;;  %v1522_v31 = vld [vmem:[#allocation6 + $0x1e0] ss:$8 sps:$4 sm:$0xff]  }
  0x6f   :  { %1072 = vmatprep.subr.bf16.mxu0 %v1477_v32 }
  0x70   :  { %499 = vmatpush1.bf16.msra.mxu1 %v1390_v54 }
  0x71   :  { %500 = vmatprep.subr.bf16.mxu1 %v1395_v55 }
  0x72   :  { %1073 = vmatpush1.bf16.msra.mxu0 %v1479_v33 }
  0x73   :  { %1085 = vmatprep.subr.bf16.mxu0 %v1482_v34  ;;  %v1527_v34 = vld [vmem:[#allocation6 + $0x1f4] ss:$8 sps:$4 sm:$0xff]  }
  0x74   :  { %501 = vmatpush1.bf16.msra.mxu1 %v1393_v58 }
  0x75   :  { %502 = vmatprep.subr.bf16.mxu1 %v1398_v59 }
  0x78   :  { %503 = vmatpush1.bf16.msra.mxu1 %v1396_v62  ;;  %v1483_v62 = vld [vmem:[#allocation6 + $0x110] ss:$8 sps:$4 sm:$0xff]  }
  0x79   :  { %504 = vmatprep.subr.bf16.mxu1 %v1401_v63  ;;  %v1488_v63 = vld [vmem:[#allocation6 + $0x124] ss:$8 sps:$4 sm:$0xff]  }
  0x7c   :  { %505 = vmatpush1.bf16.msra.mxu1 %v1399_v2  ;;  %v1489_v2 = vld [vmem:[#allocation6 + $0x130] ss:$8 sps:$4 sm:$0xff]  }
  0x7d   :  { %506 = vmatprep.subr.bf16.mxu1 %v1404_v3  ;;  %v1494_v3 = vld [vmem:[#allocation6 + $0x144] ss:$8 sps:$4 sm:$0xff]  }
  0x80   :  { %507 = vmatpush1.bf16.msra.mxu1 %v1402_v6  ;;  %v1495_v6 = vld [vmem:[#allocation6 + $0x150] ss:$8 sps:$4 sm:$0xff]  }
  0x81   :  { %508 = vmatprep.subr.bf16.mxu1 %v1407_v7  ;;  %v1500_v7 = vld [vmem:[#allocation6 + $0x164] ss:$8 sps:$4 sm:$0xff]  }
  0x84   :  { %509 = vmatpush1.bf16.msra.mxu1 %v1405_v10  ;;  %v1501_v10 = vld [vmem:[#allocation6 + $0x170] ss:$8 sps:$4 sm:$0xff]  }
  0x85   :  { %510 = vmatprep.subr.bf16.mxu1 %v1410_v11  ;;  %v1506_v11 = vld [vmem:[#allocation6 + $0x184] ss:$8 sps:$4 sm:$0xff]  }
  0x88   :  { %511 = vmatpush1.bf16.msra.mxu1 %v1408_v13  ;;  %v1509_v13 = vld [vmem:[#allocation6 + $0x194] ss:$8 sps:$4 sm:$0xff]  }
  0x89   :  { %512 = vmatprep.subr.bf16.mxu1 %v1413_v14  ;;  %v1507_v14 = vld [vmem:[#allocation6 + $0x190] ss:$8 sps:$4 sm:$0xff]  }
  0x8c   :  { %513 = vmatpush1.bf16.msra.mxu1 %v1411_v15  ;;  %v1512_v15 = vld [vmem:[#allocation6 + $0x1a4] ss:$8 sps:$4 sm:$0xff]  }
  0x8d   :  { %514 = vmatprep.subr.bf16.mxu1 %v1416_v16  ;;  %v1510_v16 = vld [vmem:[#allocation6 + $0x1a0] ss:$8 sps:$4 sm:$0xff]  }
  0x90   :  { %515 = vmatpush1.bf16.msra.mxu1 %v1414_v17  ;;  %v1515_v17 = vld [vmem:[#allocation6 + $0x1b4] ss:$8 sps:$4 sm:$0xff]  }
  0x91   :  { %516 = vmatprep.subr.bf16.mxu1 %v1419_v18  ;;  %v1513_v18 = vld [vmem:[#allocation6 + $0x1b0] ss:$8 sps:$4 sm:$0xff]  }
  0x94   :  { %517 = vmatpush1.bf16.msra.mxu1 %v1417_v19  ;;  %v1518_v19 = vld [vmem:[#allocation6 + $0x1c4] ss:$8 sps:$4 sm:$0xff]  }
  0x95   :  { %518 = vmatprep.subr.bf16.mxu1 %v1422_v20  ;;  %v1516_v20 = vld [vmem:[#allocation6 + $0x1c0] ss:$8 sps:$4 sm:$0xff]  }
  0x98   :  { %519 = vmatpush1.bf16.msra.mxu1 %v1420_v21  ;;  %v600_v21 = vsub.s32 2, %v1668_v36 }
  0x99   :  { %520 = vmatprep.subr.bf16.mxu1 %v1425_v22  ;;  %v1521_v22 = vld [vmem:[#allocation6 + $0x1d4] ss:$8 sps:$4 sm:$0xff]  }
  0x9c   :  { %521 = vmatpush1.bf16.msra.mxu1 %v1423_v23  ;;  %v604_v23 = vsub.s32 3, %v1668_v36 }
  0x9d   :  { %522 = vmatprep.subr.bf16.mxu1 %v1428_v24  ;;  %v601_v24 = vrot.slane %v1676_v38, %v600_v21 }
  0xa0   :  { %523 = vmatpush1.bf16.msra.mxu1 %v1426_v25  ;;  %v1519_v25 = vld [vmem:[#allocation6 + $0x1d0] ss:$8 sps:$4 sm:$0xff]  }
  0xa1   :  { %524 = vmatprep.subr.bf16.mxu1 %v1431_v26  ;;  %v605_v26 = vrot.slane %v1676_v38, %v604_v23  ;;  %v1525_v38 = vld [vmem:[#allocation6 + $0x1f0] ss:$8 sps:$4 sm:$0xff]  }
  0xa4   :  { %525 = vmatpush1.bf16.msra.mxu1 %v1429_v27  ;;  %v1524_v27 = vld [vmem:[#allocation6 + $0x1e4] ss:$8 sps:$4 sm:$0xff]  }
  0xa7   :  { %527 = vmatmul.mubr.bf16.vlgmr.msra.gmra.mrb[4].mxu1 %v1663_v44 }
 0x13a   :  { %v485_v42 = vpop.f32.mrb[0].mxu1 }
 0x13b   :  { %v610_v43 = vadd.f32 %v593_v40, %v485_v42  ;;  %v487_v44 = vpop.f32.mrb[1].mxu1 }
 0x13c   :  { %v611_v45 = vadd.f32 %v597_v41, %v487_v44  ;;  %v489_v46 = vpop.f32.mrb[2].mxu1 }
 0x13d   :  { %v626_v47 = vmul.f32 0.2, %v610_v43  ;;  %v614_v48 = vadd.f32 %v593_v40, %v489_v46  ;;  %v491_v49 = vpop.f32.mrb[3].mxu1  ;;  %vm618_vm0 = vcmp.gt.f32.partialorder %v610_v43, 0.0 }
 0x13e   :  { %v627_v50 = vmul.f32 0.2, %v611_v45  ;;  %v615_v51 = vadd.f32 %v597_v41, %v491_v49  ;;  %vm619_vm2 = vcmp.gt.f32.partialorder %v611_v45, 0.0 }
 0x13f   :  { %vm622_vm1 = vcmp.gt.f32.partialorder %v614_v48, 0.0  ;;  %v630_v52 = vmul.f32 0.2, %v614_v48  ;;  %v634_v54 = vsel %vm618_vm0, %v610_v43, %v626_v47 }
 0x140   :  { %v631_v53 = vmul.f32 0.2, %v615_v51  ;;  %vm623_vm3 = vcmp.gt.f32.partialorder %v615_v51, 0.0  ;;  %v635_v56 = vsel %vm619_vm2, %v611_v45, %v627_v50 }
 0x141   :  { %v638_v55 = vsel %vm622_vm1, %v614_v48, %v630_v52 }
 0x142   :  { %v639_v57 = vsel %vm623_vm3, %v615_v51, %v631_v53  ;;  %v642_v58 = vpack.c.bf16 %v638_v55, %v634_v54  ;;  %v710_v51 = vld [vmem:[%s1712_s4] sm:$0x3] }
 0x143   :  { %v643_v59 = vpack.c.bf16 %v639_v57, %v635_v56  ;;  %v715_v52 = vrot.slane %v710_v51, %v1671_v37  ;;  %v719_v53 = vrot.slane %v710_v51, %v1679_v39  ;;  %v1140_v54 = vld [vmem:[%s1713_s5] sm:$0x3] }
 0x145   :  { %1074 = vmatprep.mubr.bf16.mxu0 %v643_v59 }
 0x146   :  { %1075 = vmatmul.mubr.bf16.vlgmr.msra.gmra.mrb[0].mxu0 %v642_v58 }
 0x147   :  { %1086 = vmatpush1.bf16.msra.mxu0 %v1480_v60  ;;  %v1145_v60 = vrot.slane %v1140_v54, %v1671_v37 }
 0x148   :  { %1087 = vmatprep.subr.bf16.mxu0 %v1485_v61 }
 0x14b   :  { %1088 = vmatpush1.bf16.msra.mxu0 %v1483_v62 }
 0x14c   :  { %1089 = vmatprep.subr.bf16.mxu0 %v1488_v63 }
 0x14f   :  { %1090 = vmatpush1.bf16.msra.mxu0 %v1486_v0  ;;  %v1149_v0 = vrot.slane %v1140_v54, %v1679_v39  ;;  %v1163_v39 = vstv %s1714_s6 }
 0x150   :  { %1091 = vmatprep.subr.bf16.mxu0 %v1491_v1 }
 0x153   :  { %1092 = vmatpush1.bf16.msra.mxu0 %v1489_v2 }
 0x154   :  { %1093 = vmatprep.subr.bf16.mxu0 %v1494_v3 }
 0x157   :  { %1094 = vmatpush1.bf16.msra.mxu0 %v1492_v4 }
 0x158   :  { %1095 = vmatprep.subr.bf16.mxu0 %v1497_v5 }
 0x15b   :  { %1096 = vmatpush1.bf16.msra.mxu0 %v1495_v6 }
 0x15c   :  { %1097 = vmatprep.subr.bf16.mxu0 %v1500_v7 }
 0x15f   :  { %1098 = vmatpush1.bf16.msra.mxu0 %v1498_v8 }
 0x160   :  { %1099 = vmatprep.subr.bf16.mxu0 %v1503_v9 }
 0x163   :  { %1100 = vmatpush1.bf16.msra.mxu0 %v1501_v10 }
 0x164   :  { %1101 = vmatprep.subr.bf16.mxu0 %v1506_v11 }
 0x167   :  { %1102 = vmatpush1.bf16.msra.mxu0 %v1504_v12 }
 0x168   :  { %1103 = vmatprep.subr.bf16.mxu0 %v1509_v13 }
 0x16b   :  { %1104 = vmatpush1.bf16.msra.mxu0 %v1507_v14 }
 0x16c   :  { %1105 = vmatprep.subr.bf16.mxu0 %v1512_v15 }
 0x16f   :  { %1106 = vmatpush1.bf16.msra.mxu0 %v1510_v16 }
 0x170   :  { %1107 = vmatprep.subr.bf16.mxu0 %v1515_v17 }
 0x173   :  { %1108 = vmatpush1.bf16.msra.mxu0 %v1513_v18 }
 0x174   :  { %1109 = vmatprep.subr.bf16.mxu0 %v1518_v19 }
 0x177   :  { %1110 = vmatpush1.bf16.msra.mxu0 %v1516_v20 }
 0x178   :  { %1111 = vmatprep.subr.bf16.mxu0 %v1521_v22 }
 0x17a   :  { %v528_v28 = vpop.f32.mrb[4].mxu1 }
 0x17b   :  { %v612_v29 = vadd.f32 %v601_v24, %v528_v28  ;;  %v530_v30 = vpop.f32.mrb[5].mxu1  ;;  %1112 = vmatpush1.bf16.msra.mxu0 %v1519_v25 }
 0x17c   :  { %v613_v32 = vadd.f32 %v605_v26, %v530_v30  ;;  %v532_v33 = vpop.f32.mrb[6].mxu1  ;;  %1113 = vmatprep.subr.bf16.mxu0 %v1524_v27 }
 0x17d   :  { %v628_v35 = vmul.f32 0.2, %v612_v29  ;;  %v616_v40 = vadd.f32 %v601_v24, %v532_v33  ;;  %v534_v36 = vpop.f32.mrb[7].mxu1  ;;  %vm620_vm4 = vcmp.gt.f32.partialorder %v612_v29, 0.0 }
 0x17e   :  { %v629_v41 = vmul.f32 0.2, %v613_v32  ;;  %v617_v42 = vadd.f32 %v605_v26, %v534_v36  ;;  %vm621_vm5 = vcmp.gt.f32.partialorder %v613_v32, 0.0 }
 0x17f   :  { %vm624_vm6 = vcmp.gt.f32.partialorder %v616_v40, 0.0  ;;  %v632_v43 = vmul.f32 0.2, %v616_v40  ;;  %1114 = vmatpush1.bf16.msra.mxu0 %v1522_v31  ;;  %v636_v45 = vsel %vm620_vm4, %v612_v29, %v628_v35 }
 0x180   :  { %vm625_vm7 = vcmp.gt.f32.partialorder %v617_v42, 0.0  ;;  %v633_v44 = vmul.f32 0.2, %v617_v42  ;;  %1115 = vmatprep.subr.bf16.mxu0 %v1527_v34  ;;  %v637_v48 = vsel %vm621_vm5, %v613_v32, %v629_v41 }
 0x181   :  { %v640_v46 = vsel %vm624_vm6, %v616_v40, %v632_v43 }
 0x182   :  { %v644_v47 = vpack.c.bf16 %v640_v46, %v636_v45  ;;  %v641_v49 = vsel %vm625_vm7, %v617_v42, %v633_v44 }
 0x183   :  { %1116 = vmatpush1.bf16.msra.mxu0 %v1525_v38  ;;  %v645_v50 = vpack.c.bf16 %v641_v49, %v637_v48 }
 0x185   :  { %1117 = vmatprep.mubr.bf16.mxu0 %v645_v50 }
 0x186   :  { %1118 = vmatmul.mubr.bf16.vlgmr.msra.gmra.mrb[0].mxu0 %v644_v47 }
 0x259   :  { %v1119_v55 = vpop.f32.mrb[0].mxu0 }
 0x25a   :  { %v1319_v56 = vadd.f32 %v1119_v55, %v715_v52  ;;  %v1121_v57 = vpop.f32.mrb[1].mxu0 }
 0x25b   :  { %v1320_v58 = vadd.f32 %v1121_v57, %v719_v53  ;;  %v1123_v59 = vpop.f32.mrb[2].mxu0 }
 0x25c   :  { %vm1128_vm8 = vcmp.gt.f32.partialorder %v1319_v56, 0.0  ;;  %v1132_v61 = vmul.f32 0.2, %v1319_v56  ;;  %v1321_v62 = vadd.f32 %v1123_v59, %v715_v52  ;;  %v1125_v63 = vpop.f32.mrb[3].mxu0 }
 0x25d   :  { %vm1129_vm9 = vcmp.gt.f32.partialorder %v1320_v58, 0.0  ;;  %v1133_v1 = vmul.f32 0.2, %v1320_v58  ;;  %v1322_v2 = vadd.f32 %v1125_v63, %v719_v53 }
 0x25e   :  { %vm1130_vm10 = vcmp.gt.f32.partialorder %v1321_v62, 0.0  ;;  %v1134_v3 = vmul.f32 0.2, %v1321_v62  ;;  %v1136_v4 = vsel %vm1128_vm8, %v1319_v56, %v1132_v61 }
 0x25f   :  { %vm1131_vm11 = vcmp.gt.f32.partialorder %v1322_v2, 0.0  ;;  %v1135_v5 = vmul.f32 0.2, %v1322_v2  ;;  %v1137_v6 = vsel %vm1129_vm9, %v1320_v58, %v1133_v1  ;;  %v1152_v7 = vmul.f32 %v1145_v60, %v1136_v4 }
 0x260   :  { %v1153_v8 = vmul.f32 %v1149_v0, %v1137_v6  ;;  %v1138_v9 = vsel %vm1130_vm10, %v1321_v62, %v1134_v3 }
 0x261   :  { %v1139_v10 = vsel %vm1131_vm11, %v1322_v2, %v1135_v5  ;;  %v1154_v37 = vmul.f32 %v1145_v60, %v1138_v9 }
 0x262   :  { %v1156_v11 = vadd.f32 %v1153_v8, %v1152_v7  ;;  %v1155_v12 = vmul.f32 %v1149_v0, %v1139_v10 }
 0x264   :  { %1157 = vadd.xlane.f32.xlu0 %v1156_v11  ;;  %v1159_v13 = vadd.f32 %v1155_v12, %v1154_v37 }
 0x268   :  { %1160 = vadd.xlane.f32.xlu0 %v1159_v13 }
 0x2f1   :  { %v1158_v14 = vpop.xlane.xlu0 %1157 }
 0x2f2   :  { %v1164_v15 = vadd.f32 %v1163_v39, %v1158_v14 }
 0x2f4   :  { %v1317_v16 = vmul.f32 -1.442695, %v1164_v15 }
 0x2f5   :  { %v1161_v17 = vpop.xlane.xlu0 %1160 }
 0x2f6   :  { %1528 = vpow2.f32 %v1317_v16  ;;  %v1165_v18 = vadd.f32 %v1163_v39, %v1161_v17 }
 0x2f8   :  { %v1318_v19 = vmul.f32 -1.442695, %v1165_v18 }
 0x2fa   :  { %1530 = vpow2.f32 %v1318_v19 }
 0x300   :  { %v1529_v20 = vpop.eup %1528 }
 0x301   :  { %v1172_v21 = vadd.f32 1.0, %v1529_v20 }
 0x303   :  { %1532 = vrcp.f32 %v1172_v21 }
 0x304   :  { %v1531_v22 = vpop.eup %1530 }
 0x305   :  { %v1173_v23 = vadd.f32 1.0, %v1531_v22 }
 0x307   :  { %1534 = vrcp.f32 %v1173_v23 }
 0x30d   :  { %v1533_v24 = vpop.eup %1532 }
 0x30e   :  { %1179 = vst.msk [vmem:[%s1715_s7] sm:$0xff] %vm1178_vm12, %v1533_v24 }
 0x311   :  { %v1535_v25 = vpop.eup %1534 }
 0x312   :  { %1180 = vst.msk [vmem:[%s1715_s7 + $0x8] sm:$0xff] %vm1178_vm12, %v1535_v25 }
 0x313   :  { %1185 = vsyncpa [#allocation5], 1 }
 0x314   :  { %1186 = vsyncpa [#allocation7], 1 }

</bundles_post_ra>
